<compile_context>
chip_gen: v7x
topology: tpu7x:2x2x1
jax: 0.10.0
libtpu: 0.0.40
codegen_flags: <defaults>
</compile_context>

<pallas_src>
import functools
import jax
import jax.numpy as jnp
from jax.experimental import pallas as pl
from jax.experimental.pallas import tpu as pltpu


def _cdiv(a, b):
    return -(-a // b)


def _soft_ce_kernel(pred_ref, target_ref, out_ref, *, ignore_index):
    """One row-tile: emit (loss partial, mask-count partial) for this tile."""
    t_raw = target_ref[...]                       # native dtype (mask on native)
    mask = (t_raw != jnp.asarray(ignore_index, t_raw.dtype)).astype(jnp.float32)
    t = t_raw.astype(jnp.float32) * mask          # masked soft targets (TM, Cp)
    x = pred_ref[...].astype(jnp.float32)         # logits            (TM, Cp)

    # log-softmax pieces over the class (lane) axis; algebra folded:
    #   sum_c -(z - lse) * t * mask = lse * sum_c(t*mask) - sum_c(z * t*mask)
    m = jnp.max(x, axis=-1, keepdims=True)                      # (TM, 1)
    z = x - m
    lse = jnp.log(jnp.sum(jnp.exp(z), axis=-1, keepdims=True))  # (TM, 1)

    s_t = jnp.sum(t, axis=-1, keepdims=True)                    # (TM, 1)
    s_zt = jnp.sum(z * t, axis=-1, keepdims=True)               # (TM, 1)
    loss_rows = lse * s_t - s_zt                                 # (TM, 1)

    loss_sum = jnp.sum(loss_rows)     # per-tile scalar (one cheap reduce / tile)
    mask_sum = jnp.sum(mask)

    # Lane-dense (1, 8, 128) partial block: sublane 0 = loss, sublane 1 = count.
    sub = jax.lax.broadcasted_iota(jnp.int32, (1, 8, 128), 1)
    out_ref[...] = jnp.where(sub == 0, loss_sum,
                             jnp.where(sub == 1, mask_sum, 0.0))


def _choose_tile_rows(n_rows, c_pad, itemsize):
    """Largest row tile that keeps double-buffered inputs comfortably in VMEM."""
    align = max(8, 32 // itemsize)            # f32: 8, bf16: 16, 8-bit: 32
    per_block_budget = 2 * 1024 * 1024        # bytes per input block (x2 in x2 buf)
    tr = max(align, (per_block_budget // (c_pad * itemsize)) // align * align)
    tr = min(tr, 4096)
    n_aligned = _cdiv(n_rows, align) * align
    tr = min(tr, n_aligned)
    # shrink to minimize row padding while keeping the same number of tiles
    num_tiles = _cdiv(n_aligned, tr)
    tr = _cdiv(_cdiv(n_aligned, num_tiles), align) * align
    return tr


def soft_cross_entropy_loss(pred, target, *, ignore_index=-1, times=1.0,
                            eps=1e-7, tile_rows=None):
    # TODO(synk): optional per-class `weight` tensor not implemented (module default is None).
    assert pred.shape == target.shape
    C = pred.shape[-1]
    pred2 = pred.reshape(-1, C)
    target2 = target.reshape(-1, C)
    N = pred2.shape[0]

    # --- pad class dim to a lane-dense multiple of 128 ---------------------
    Cp = _cdiv(C, 128) * 128
    if Cp != C:
        neg = float(jnp.finfo(pred2.dtype).min) / 2.0   # exp() underflows to 0
        pred2 = jnp.pad(pred2, ((0, 0), (0, Cp - C)), constant_values=neg)
        target2 = jnp.pad(target2, ((0, 0), (0, Cp - C)),
                          constant_values=float(ignore_index))

    itemsize = pred2.dtype.itemsize
    if tile_rows is None:
        tile_rows = _choose_tile_rows(N, Cp, itemsize)

    # --- pad rows; padded rows carry ignore_index so the mask count is exact
    Np = _cdiv(N, tile_rows) * tile_rows
    if Np != N:
        pred2 = jnp.pad(pred2, ((0, Np - N), (0, 0)))
        target2 = jnp.pad(target2, ((0, Np - N), (0, 0)),
                          constant_values=float(ignore_index))

    num_tiles = Np // tile_rows

    # double-buffered inputs + in-kernel f32 temporaries, with headroom;
    # stays within the 64 MiB physical VMEM of v7x.
    block_in_bytes = tile_rows * Cp * itemsize
    vmem_limit = int(min(max(4 * block_in_bytes + 10 * tile_rows * Cp * 4,
                             32 * 1024 * 1024),
                         56 * 1024 * 1024))

    kernel = functools.partial(_soft_ce_kernel, ignore_index=float(ignore_index))

    partials = pl.pallas_call(
        kernel,
        out_shape=jax.ShapeDtypeStruct((num_tiles, 8, 128), jnp.float32),
        grid_spec=pltpu.PrefetchScalarGridSpec(
            num_scalar_prefetch=0,
            grid=(num_tiles,),
            in_specs=[
                pl.BlockSpec((tile_rows, Cp), lambda i: (i, 0)),
                pl.BlockSpec((tile_rows, Cp), lambda i: (i, 0)),
            ],
            out_specs=pl.BlockSpec((1, 8, 128), lambda i: (i, 0, 0)),
        ),
        compiler_params=pltpu.CompilerParams(
            dimension_semantics=("parallel",),   # independent tiles -> both TCs on v7x
            vmem_limit_bytes=vmem_limit,
        ),
    )(pred2, target2)

    loss_total = jnp.sum(partials[:, 0, 0])
    mask_total = jnp.sum(partials[:, 1, 0])
    return times * loss_total / (mask_total + eps)


def _reference(pred, target, ignore_index=-1, times=1.0, eps=1e-7):
    mask = (target != ignore_index).astype(jnp.float32)
    logp = jax.nn.log_softmax(pred, axis=-1)
    loss = -logp * target * mask
    return times * loss.sum() / (mask.sum() + eps)


if __name__ == "__main__":
    # small shapes: batch=2, seq=8 -> 16 rows, 32 classes
    B, S, C = 2, 8, 32
    key = jax.random.PRNGKey(0)
    k1, k2, k3 = jax.random.split(key, 3)

    pred = jax.random.normal(k1, (B, S, C), dtype=jnp.float32)
    # soft targets (probability-like), with some entries marked as ignore_index
    target = jax.nn.softmax(jax.random.normal(k2, (B, S, C), dtype=jnp.float32), axis=-1)
    ignore_mask = jax.random.bernoulli(k3, p=0.2, shape=(B, S, C))
    target = jnp.where(ignore_mask, jnp.float32(-1.0), target)

    out = soft_cross_entropy_loss(pred, target, ignore_index=-1, times=1.0, eps=1e-7)
    out = jax.block_until_ready(out)

    ref = _reference(pred, target)
    assert jnp.allclose(out, ref, rtol=1e-5, atol=1e-5), (out, ref)
    print("KERNEL_OK")
</pallas_src>

<mosaic_0001>
module attributes {stable_mosaic.version = 11 : i64} {
  func.func @_soft_ce_kernel(%arg0: i32, %arg1: memref<16x128xf32, #tpu.memory_space<vmem>>, %arg2: memref<16x128xf32, #tpu.memory_space<vmem>>, %arg3: memref<1x8x128xf32, #tpu.memory_space<vmem>>) attributes {dimension_semantics = [#tpu.dimension_semantics<parallel>], iteration_bounds = array<i64: 1>, scalar_prefetch = 0 : i64, scratch_operands = 0 : i64, tpu.core_type = #tpu.core_type<tc>, window_params = [{transform_indices = @transform_0, window_bounds = array<i64: 16, 128>}, {transform_indices = @transform_1, window_bounds = array<i64: 16, 128>}, {transform_indices = @transform_2, window_bounds = array<i64: 1, 8, 128>}]} {
    %c0 = arith.constant 0 : index
    %c0_0 = arith.constant 0 : index
    %0 = vector.load %arg2[%c0, %c0_0] : memref<16x128xf32, #tpu.memory_space<vmem>>, vector<16x128xf32>
    %cst = arith.constant -1.000000e+00 : f32
    %1 = vector.broadcast %cst : f32 to vector<16x128xf32>
    %2 = arith.cmpf one, %0, %1 : vector<16x128xf32>
    %3 = arith.extui %2 : vector<16x128xi1> to vector<16x128xi32>
    %4 = arith.sitofp %3 : vector<16x128xi32> to vector<16x128xf32>
    %5 = arith.mulf %0, %4 : vector<16x128xf32>
    %c0_1 = arith.constant 0 : index
    %c0_2 = arith.constant 0 : index
    %6 = vector.load %arg1[%c0_1, %c0_2] : memref<16x128xf32, #tpu.memory_space<vmem>>, vector<16x128xf32>
    %cst_3 = arith.constant dense<0xFF800000> : vector<16xf32>
    %7 = vector.multi_reduction <maximumf>, %6, %cst_3 [1] : vector<16x128xf32> to vector<16xf32>
    %8 = vector.shape_cast %7 : vector<16xf32> to vector<16x1xf32>
    %9 = vector.broadcast %8 : vector<16x1xf32> to vector<16x128xf32>
    %10 = arith.subf %6, %9 : vector<16x128xf32>
    %11 = math.exp %10 : vector<16x128xf32>
    %cst_4 = arith.constant dense<0.000000e+00> : vector<16xf32>
    %12 = vector.multi_reduction <add>, %11, %cst_4 [1] : vector<16x128xf32> to vector<16xf32>
    %13 = vector.shape_cast %12 : vector<16xf32> to vector<16x1xf32>
    %14 = math.log %13 : vector<16x1xf32>
    %cst_5 = arith.constant dense<0.000000e+00> : vector<16xf32>
    %15 = vector.multi_reduction <add>, %5, %cst_5 [1] : vector<16x128xf32> to vector<16xf32>
    %16 = vector.shape_cast %15 : vector<16xf32> to vector<16x1xf32>
    %17 = arith.mulf %10, %5 : vector<16x128xf32>
    %cst_6 = arith.constant dense<0.000000e+00> : vector<16xf32>
    %18 = vector.multi_reduction <add>, %17, %cst_6 [1] : vector<16x128xf32> to vector<16xf32>
    %19 = vector.shape_cast %18 : vector<16xf32> to vector<16x1xf32>
    %20 = arith.mulf %14, %16 : vector<16x1xf32>
    %21 = arith.subf %20, %19 : vector<16x1xf32>
    %22 = vector.shape_cast %21 : vector<16x1xf32> to vector<1x16x1xf32>
    %cst_7 = arith.constant dense<0.000000e+00> : vector<1xf32>
    %23 = vector.multi_reduction <add>, %22, %cst_7 [1, 2] : vector<1x16x1xf32> to vector<1xf32>
    %24 = vector.shape_cast %23 : vector<1xf32> to vector<1x1x1xf32>
    %25 = vector.extract %24[0, 0, 0] : f32 from vector<1x1x1xf32>
    %26 = vector.shape_cast %4 : vector<16x128xf32> to vector<1x16x128xf32>
    %cst_8 = arith.constant dense<0.000000e+00> : vector<1xf32>
    %27 = vector.multi_reduction <add>, %26, %cst_8 [1, 2] : vector<1x16x128xf32> to vector<1xf32>
    %28 = vector.shape_cast %27 : vector<1xf32> to vector<1x1x1xf32>
    %29 = vector.extract %28[0, 0, 0] : f32 from vector<1x1x1xf32>
    %30 = tpu.iota {dimensions = array<i32: 1>} : vector<1x8x128xi32>
    %c0_i32 = arith.constant 0 : i32
    %31 = vector.broadcast %c0_i32 : i32 to vector<1x8x128xi32>
    %32 = arith.cmpi eq, %30, %31 : vector<1x8x128xi32>
    %c1_i32 = arith.constant 1 : i32
    %33 = vector.broadcast %c1_i32 : i32 to vector<1x8x128xi32>
    %34 = arith.cmpi eq, %30, %33 : vector<1x8x128xi32>
    %cst_9 = arith.constant 0.000000e+00 : f32
    %35 = vector.broadcast %29 : f32 to vector<1x8x128xf32>
    %36 = vector.broadcast %cst_9 : f32 to vector<1x8x128xf32>
    %37 = arith.select %34, %35, %36 : vector<1x8x128xi1>, vector<1x8x128xf32>
    %38 = vector.broadcast %25 : f32 to vector<1x8x128xf32>
    %39 = arith.select %32, %38, %37 : vector<1x8x128xi1>, vector<1x8x128xf32>
    %c0_10 = arith.constant 0 : index
    %c0_11 = arith.constant 0 : index
    %c0_12 = arith.constant 0 : index
    %40 = vector.load %arg3[%c0_10, %c0_11, %c0_12] : memref<1x8x128xf32, #tpu.memory_space<vmem>>, vector<1x8x128xf32>
    tpu.vector_store %arg3[%c0_10, %c0_11, %c0_12], %39 {strides = array<i32>} : memref<1x8x128xf32, #tpu.memory_space<vmem>>, vector<1x8x128xf32>,
    return
  }
  func.func @transform_0(%arg0: i32) -> (i32, i32) {
    %c0_i32 = arith.constant 0 : i32
    %c0_i32_0 = arith.constant 0 : i32
    return %arg0, %c0_i32 : i32, i32
  }
  func.func @transform_1(%arg0: i32) -> (i32, i32) {
    %c0_i32 = arith.constant 0 : i32
    %c0_i32_0 = arith.constant 0 : i32
    return %arg0, %c0_i32 : i32, i32
  }
  func.func @transform_2(%arg0: i32) -> (i32, i32, i32) {
    %c0_i32 = arith.constant 0 : i32
    %c0_i32_0 = arith.constant 0 : i32
    %c0_i32_1 = arith.constant 0 : i32
    return %arg0, %c0_i32, %c0_i32_0 : i32, i32, i32
  }
}

</mosaic_0001>

<bundles_post_ra>
// kernel: tpu_custom_call.1
= control target key start
LH: loop header
LB: loop body
LE: loop exit
PB: predicated region body
PF: predicated region fallthrough
CT: control target
= control target key end

     0   :  { %7 = vsyncpa [#allocation3], 0  ;;  %s281_s0 = inlined_call_operand.hbm [shape: f32[16,128], index: 0, kind: input, shape index: {}]   ;;  %s282_s1 = inlined_call_operand.hbm [shape: f32[16,128], index: 1, kind: input, shape index: {}]   ;;  %s283_s2 = inlined_call_operand.hbm [shape: f32[1,8,128], index: 2, kind: output, shape index: {}]  }
   0x1   :  { %8 = vsyncpa [#allocation6], 0 }
   0x2   :  { %9 = vsyncpa [#allocation4], 0  ;;  %s224_s9 = smov [#allocation2]   ;;  %s152_s13 = scalar_lea.hbm %s281_s0, 256 }
   0x3   :  { %s15_s10 = sshll.u32 %s224_s9, 4  ;;  %p153_p0 = scmp.ne.s32.totalorder %s281_s0, %s152_s13  ;;  %s16_s10 = int_to_ptr.vmem [resolvable:$true] %s15_s10 }
   0x4   :  { %p156_p1 = scmp.lt.u32.totalorder %s152_s13, %s281_s0 }
   0x6   :  { %p158_p2 = pnand %p156_p1, %p153_p0 }
   0x8   :  { %161 = shalt.err (!%p158_p2)
}
   0x9   :  { %s162_s18 = scalar_lea.vmem %s16_s10, 256  ;;  %p167_p4 = scmp.lt.s32.totalorder %s16_s10, %s16_s10 }
   0xa   :  { %p163_p3 = scmp.ne.s32.totalorder %s16_s10, %s162_s18  ;;  %p168_p5 = scmp.lt.s32.totalorder %s162_s18, %s162_s18 }
   0xc   :  { %p169_p6 = por %p168_p5, %p167_p4 }
   0xe   :  { %p170_p7 = pnand %p169_p6, %p163_p3 }
  0x10   :  { %173 = shalt.err (!%p170_p7)
}
  0x11   :  { %s225_s19 = smov 128   ;;  %s226_s20 = smov 8  }
  0x12   :  { %21 = dma.hbm_to_vmem [thread:$0]  %s281_s0, 256, %s16_s10, [#allocation3], %s225_s19, %s225_s19, %s226_s20  }
  0x13   :  { %s227_s23 = smov [#allocation5]   ;;  %s174_s27 = scalar_lea.hbm %s282_s1, 256 }
  0x14   :  { %s27_s24 = sshll.u32 %s227_s23, 4  ;;  %p175_p8 = scmp.ne.s32.totalorder %s282_s1, %s174_s27  ;;  %s28_s24 = int_to_ptr.vmem [resolvable:$true] %s27_s24 }
  0x15   :  { %p178_p9 = scmp.lt.u32.totalorder %s174_s27, %s282_s1 }
  0x17   :  { %p180_p10 = pnand %p178_p9, %p175_p8 }
  0x19   :  { %183 = shalt.err (!%p180_p10)
}
  0x1a   :  { %s184_s4 = scalar_lea.vmem %s28_s24, 256  ;;  %p189_p12 = scmp.lt.s32.totalorder %s28_s24, %s28_s24 }
  0x1b   :  { %p185_p11 = scmp.ne.s32.totalorder %s28_s24, %s184_s4  ;;  %p190_p13 = scmp.lt.s32.totalorder %s184_s4, %s184_s4 }
  0x1d   :  { %p191_p0 = por %p190_p13, %p189_p12 }
  0x1f   :  { %p192_p1 = pnand %p191_p0, %p185_p11 }
  0x21   :  { %195 = shalt.err (!%p192_p1)
}
  0x22   :  { %33 = dma.hbm_to_vmem [thread:$0]  %s282_s1, 256, %s28_s24, [#allocation6], %s225_s19, %s225_s19, %s226_s20  }
  0x23   :  { %218 = dma.done.wait [#allocation3], 256  }
  0x24   :  { %219 = vsyncadd [#allocation3], 4294967040 }
  0x25   :  { %220 = dma.done.wait [#allocation6], 256  }
  0x26   :  { %221 = vsyncadd [#allocation6], 4294967040  ;;  %v50_v0 = vld [vmem:[#allocation2] sm:$0xff]  ;;  %v51_v1 = vld [vmem:[#allocation2 + $0x8] sm:$0xff]  ;;  %v228_v3 = vmov 0.0   ;;  %vm84_vm2 = vcmask 7168   ;;  %v107_v51 = vlaneseq }
  0x27   :  { %52 = vmax.xlane.f32.xlu0 %v50_v0  ;;  %v40_v2 = vld [vmem:[#allocation5] sm:$0xff]  ;;  %v41_v13 = vld [vmem:[#allocation5 + $0x8] sm:$0xff]  ;;  %s229_s6 = smov [#allocation7]  }
  0x28   :  { %vm42_vm0 = vcmp.ne.f32.partialorder %v40_v2, -1.0  ;;  %vm43_vm1 = vcmp.ne.f32.partialorder %v41_v13, -1.0  ;;  %v108_v52 = vshrl.u32 %v107_v51, 7  ;;  %s122_s7 = sshll.u32 %s229_s6, 4  ;;  %s123_s7 = int_to_ptr.vmem [resolvable:$true] %s122_s7 }
  0x29   :  { %v132_v4 = vsel %vm42_vm0, 1.0, %v228_v3  ;;  %v133_v16 = vsel %vm43_vm1, 1.0, %v228_v3  ;;  %s196_s9 = scalar_lea.vmem %s123_s7, 128  ;;  %p201_p3 = scmp.lt.s32.totalorder %s123_s7, %s123_s7 }
  0x2a   :  { %v48_v5 = vmul.f32 %v132_v4, %v40_v2  ;;  %v49_v17 = vmul.f32 %v133_v16, %v41_v13  ;;  %v97_v19 = vadd.f32 %v133_v16, %v132_v4  ;;  %vm110_vm3 = vcmp.eq.s32.totalorder %v108_v52, 1  ;;  %p197_p2 = scmp.ne.s32.totalorder %s123_s7, %s196_s9  ;;  %p202_p4 = scmp.lt.s32.totalorder %s196_s9, %s196_s9 }
  0x2b   :  { %54 = vmax.xlane.f32.xlu0 %v51_v1  ;;  %vm109_vm4 = vcmp.eq.s32.totalorder %v108_v52, 0 }
  0x2c   :  { %p203_p5 = por %p202_p4, %p201_p3 }
  0x2e   :  { %p204_p6 = pnand %p203_p5, %p197_p2 }
  0x2f   :  { %70 = vadd.xlane.f32.xlu0 %v48_v5 }
  0xb4   :  { %v53_v6 = vpop.xlane.xlu0 %52 }
  0xb5   :  { %v56_v7 = vsub.f32 %v50_v0, %v53_v6 }
  0xb7   :  { %v58_v8 = vmul.f32 1.442695, %v56_v7  ;;  %v74_v9 = vmul.f32 %v56_v7, %v48_v5 }
  0xb8   :  { %v55_v10 = vpop.xlane.xlu0 %54 }
  0xb9   :  { %v57_v11 = vsub.f32 %v51_v1, %v55_v10  ;;  %76 = vadd.xlane.f32.xlu0 %v74_v9  ;;  %144 = vpow2.f32 %v58_v8 }
  0xbb   :  { %v60_v12 = vmul.f32 1.442695, %v57_v11  ;;  %v75_v18 = vmul.f32 %v57_v11, %v49_v17 }
  0xbc   :  { %v71_v23 = vpop.xlane.xlu0 %70 }
  0xbd   :  { %146 = vpow2.f32 %v60_v12 }
  0xc3   :  { %v145_v14 = vpop.eup %144 }
  0xc4   :  { %62 = vadd.xlane.f32.xlu1 %v145_v14 }
  0xc7   :  { %v147_v15 = vpop.eup %146 }
  0xc8   :  { %64 = vadd.xlane.f32.xlu1 %v147_v15 }
  0xcc   :  { %72 = vadd.xlane.f32.xlu1 %v49_v17 }
  0xd0   :  { %78 = vadd.xlane.f32.xlu1 %v75_v18 }
  0xd4   :  { %98 = vadd.xlane.f32.xlu1 %v97_v19 }
 0x146   :  { %v77_v29 = vpop.xlane.xlu0 %76 }
 0x151   :  { %v63_v20 = vpop.xlane.xlu1 %62 }
 0x152   :  { %148 = vlog2.f32 %v63_v20 }
 0x155   :  { %v65_v21 = vpop.xlane.xlu1 %64 }
 0x156   :  { %150 = vlog2.f32 %v65_v21 }
 0x159   :  { %v73_v25 = vpop.xlane.xlu1 %72 }
 0x15c   :  { %v149_v22 = vpop.eup %148 }
 0x15d   :  { %v67_v24 = vmul.f32 0.6931472, %v149_v22  ;;  %v79_v32 = vpop.xlane.xlu1 %78 }
 0x15f   :  { %v80_v26 = vmul.f32 %v71_v23, %v67_v24 }
 0x160   :  { %v151_v27 = vpop.eup %150 }
 0x161   :  { %v69_v28 = vmul.f32 0.6931472, %v151_v27  ;;  %v82_v31 = vsub.f32 %v80_v26, %v77_v29  ;;  %v99_v37 = vpop.xlane.xlu1 %98 }
 0x162   :  { %v100_v38 = vrot.slane %v99_v37, 4 }
 0x163   :  { %v81_v30 = vmul.f32 %v73_v25, %v69_v28  ;;  %v85_v34 = vsel %vm84_vm2, %v82_v31, 0.0 }
 0x164   :  { %v101_v39 = vadd.f32 %v100_v38, %v99_v37 }
 0x165   :  { %v83_v33 = vsub.f32 %v81_v30, %v79_v32 }
 0x166   :  { %v102_v40 = vrot.slane %v101_v39, 2 }
 0x167   :  { %v86_v35 = vsel %vm84_vm2, %v83_v33, 0.0 }
 0x168   :  { %v87_v36 = vadd.f32 %v86_v35, %v85_v34  ;;  %v103_v44 = vadd.f32 %v102_v40, %v101_v39 }
 0x16a   :  { %88 = vadd.xlane.f32.xlu0 %v87_v36  ;;  %v104_v47 = vrot.slane %v103_v44, 1 }
 0x16c   :  { %v105_v50 = vadd.f32 %v104_v47, %v103_v44 }
 0x1f7   :  { %v89_v41 = vpop.xlane.xlu0 %88 }
 0x1f8   :  { %v90_v42 = vrot.slane %v89_v41, 4 }
 0x1fa   :  { %v91_v43 = vadd.f32 %v90_v42, %v89_v41 }
 0x1fc   :  { %v92_v45 = vrot.slane %v91_v43, 2 }
 0x1fe   :  { %v93_v46 = vadd.f32 %v92_v45, %v91_v43 }
 0x200   :  { %v94_v48 = vrot.slane %v93_v46, 1 }
 0x202   :  { %v95_v49 = vadd.f32 %v94_v48, %v93_v46 }
 0x204   :  { %134 = vpush %v95_v49 }
 0x205   :  { %136 = vpush %v105_v50 }
 0x235   :  { %s135_s1 = spop %134 }
 0x236   :  { %v113_v53 = vstv %s135_s1  ;;  %s137_s8 = spop %136 }
 0x237   :  { %v111_v54 = vstv %s137_s8 }
 0x238   :  { %v112_v55 = vsel %vm110_vm3, %v111_v54, 0.0 }
 0x239   :  { %v114_v56 = vsel %vm109_vm4, %v113_v53, %v112_v55 }
 0x23a   :  { %115 = vst [vmem:[#allocation7] sm:$0xff] %v114_v56 }
 0x23b   :  { %207 = shalt.err (!%p204_p6)
}
 0x23c   :  { %s208_s12 = scalar_lea.hbm %s283_s2, 128 }
 0x23d   :  { %p209_p7 = scmp.ne.s32.totalorder %s283_s2, %s208_s12  ;;  %p212_p8 = scmp.lt.u32.totalorder %s208_s12, %s283_s2 }
 0x23f   :  { %p214_p9 = pnand %p212_p8, %p209_p7 }
 0x241   :  { %217 = shalt.err (!%p214_p9)
}
 0x242   :  { %125 = dma.vmem_to_hbm [thread:$0]  %s123_s7, 128, %s283_s2, [#allocation4]  }
 0x243   :  { %222 = dma.done.wait [#allocation4], 128  }
 0x244   :  { %223 = vsyncadd [#allocation4], 4294967168 }
 0x245   :  { %129 = vsyncpa [#allocation3], 1 }
 0x246   :  { %130 = vsyncpa [#allocation6], 1 }
 0x247   :  { %131 = vsyncpa [#allocation4], 1 }

</bundles_post_ra>
